<compile_context>
chip_gen: v7x
topology: tpu7x:2x2x1
jax: 0.10.0
libtpu: 0.0.40
codegen_flags: <defaults>
</compile_context>

<pallas_src>
import math

import jax
import jax.numpy as jnp
from jax.experimental import pallas as pl
from jax.experimental.pallas import tpu as pltpu

# ---- deterministic "config" (cfg.DATA['NUM']) and hyperparameters ----
NUM_CLASS = 4      # stands in for cfg.DATA['NUM']; matches channel count below
ALPHA = 2
BETA = 4
DELTA = 0.01

# Tiling for the flattened elementwise kernel.
LANES = 128
TARGET_TILE_ROWS = 8192            # 8192 x 128 x 4 B = 4 MiB per f32 tile
TARGET_BLOCK_BYTES = 4 * 1024 * 1024
MIN_GRID_STEPS = 4                 # keep the pipeline + both v7x TCs busy
VMEM_LIMIT_BYTES = 32 * 1024 * 1024  # 24 MiB of pipeline buffers + headroom


def _cdiv(a, b):
    return -(-a // b)


def _round_up(x, m):
    return _cdiv(x, m) * m


def _smooth_heatmap_loss_kernel(x_ref, t_ref, o_ref):
    """Elementwise hot path: sigmoid + focal/smoothed heatmap loss."""
    x = x_ref[...].astype(jnp.float32)
    t = t_ref[...].astype(jnp.float32)

    one = jnp.float32(1.0)

    p = jax.nn.sigmoid(x)          # sigmoid(inputs)
    omp = one - p                  # 1 - sigmoid(inputs)
    is_center = t == one

    targets_smooth = t * jnp.float32(1.0 - DELTA) + jnp.float32(DELTA / NUM_CLASS)

    # (1 - ts) ** beta with beta = 4, powers by multiply (VPU only).
    omts = one - targets_smooth
    omts2 = omts * omts
    pow_omts_beta = omts2 * omts2

    # The center/other branches are mutually exclusive per element, so a single
    # select of the polynomial coefficient replaces the two masked terms + add.
    coeff = jnp.where(
        is_center,
        jnp.float32(5.0) * targets_smooth * (omp * omp),   # center branch
        pow_omts_beta * (p * p),                           # other branch
    )

    # Single transcendental log; the +1e-14 clamp matches the PyTorch forward.
    # (A log-sigmoid / shared-exp rewrite would shave one EUP push but changes
    #  saturated-logit behaviour vs. the +1e-14 clamp, so it is not applied.)
    log_sel = jnp.log(jnp.where(is_center, p, omp) + jnp.float32(1e-14))

    o_ref[...] = (-coeff * log_sel).astype(o_ref.dtype)


def _pick_tile_rows(rows, cols, target_tile_rows, row_quantum):
    """Choose a row-tile: multiple of row_quantum, bounded by a VMEM byte
    budget, and small enough to give >= MIN_GRID_STEPS grid steps."""
    if rows <= row_quantum:
        return rows  # full-extent block (allowed even when not quantum-aligned)
    budget = max(row_quantum,
                 (TARGET_BLOCK_BYTES // (cols * 4)) // row_quantum * row_quantum)
    steps = max(row_quantum, _round_up(_cdiv(rows, MIN_GRID_STEPS), row_quantum))
    target = max(row_quantum, _round_up(target_tile_rows, row_quantum))
    return min(budget, steps, target)


def smooth_heatmap_loss(inputs, targets, *, target_tile_rows=TARGET_TILE_ROWS,
                        out_dtype=None):
    """Pallas-backed Smooth_Heatmap_Loss.forward.

    inputs, targets: arrays of identical shape (e.g. (B, C, H, W)).
    Returns the elementwise loss with the same shape (no reduction), in
    `out_dtype` (defaults to the input dtype for floating inputs).
    """
    assert inputs.shape == targets.shape, "inputs/targets must have identical shapes"
    orig_shape = inputs.shape
    if out_dtype is None:
        out_dtype = (inputs.dtype if jnp.issubdtype(inputs.dtype, jnp.floating)
                     else jnp.float32)

    total = int(math.prod(orig_shape)) if len(orig_shape) else 1

    if total % LANES == 0:
        # Fast path: lane-dense (rows, 128) slab; the reshape is a free bitcast.
        rows, cols = total // LANES, LANES
    else:
        # Copy-free fallback: fold everything but the trailing dim into rows.
        # Partial-lane stores are slower per element, but there is no extra
        # HBM traffic from padding/concatenating the inputs or slicing the
        # output (which previously doubled the bandwidth on this path).
        cols = int(orig_shape[-1]) if len(orig_shape) else 1
        rows = total // cols

    x2d = jnp.reshape(inputs, (rows, cols))
    t2d = jnp.reshape(targets, (rows, cols))

    # Sublane quantum per dtype (f32 -> 8, bf16 -> 16, 1-byte -> 32) so packed
    # dtypes always get layout-friendly tiles.
    min_itemsize = min(jnp.dtype(d).itemsize
                       for d in (inputs.dtype, targets.dtype, out_dtype))
    row_quantum = 8 * max(1, 4 // max(1, min_itemsize))

    tile_rows = _pick_tile_rows(rows, cols, target_tile_rows, row_quantum)
    grid = (_cdiv(rows, tile_rows),)
    block = pl.BlockSpec((tile_rows, cols), lambda i: (i, 0))

    out2d = pl.pallas_call(
        _smooth_heatmap_loss_kernel,
        out_shape=jax.ShapeDtypeStruct((rows, cols), out_dtype),
        grid_spec=pltpu.PrefetchScalarGridSpec(
            num_scalar_prefetch=0,
            grid=grid,
            in_specs=[block, block],
            out_specs=block,
        ),
        compiler_params=pltpu.CompilerParams(
            dimension_semantics=("parallel",),
            vmem_limit_bytes=VMEM_LIMIT_BYTES,
        ),
    )(x2d, t2d)

    return out2d.reshape(orig_shape)


def _reference(inputs, targets):
    """Pure-JAX reference mirroring the PyTorch forward for verification."""
    x = jax.nn.sigmoid(inputs.astype(jnp.float32))
    t = targets.astype(jnp.float32)
    center_id = (t == 1.0).astype(jnp.float32)
    other_id = (t != 1.0).astype(jnp.float32)
    ts = t * (1 - DELTA) + DELTA * 1.0 / NUM_CLASS
    center_loss = -center_id * ts * (1.0 - x) ** ALPHA * jnp.log(x + 1e-14) * 5
    other_loss = -other_id * (1 - ts) ** BETA * x ** ALPHA * jnp.log(1.0 - x + 1e-14)
    return center_loss + other_loss


def _make_example(key, shape):
    k1, k2 = jax.random.split(key)
    inputs = jax.random.normal(k1, shape, dtype=jnp.float32)
    # Heatmap-like target: a few exact 1.0 peaks, rest in [0, 0.9)
    targets = jax.random.uniform(k2, shape, dtype=jnp.float32) * 0.9
    targets = targets.at[:, :, 4, 7].set(1.0)
    targets = targets.at[:, :, 10, 3].set(1.0)
    return inputs, targets


if __name__ == "__main__":
    key = jax.random.PRNGKey(0)
    k_a, k_b, k_c = jax.random.split(key, 3)

    # Case 1: total % 128 == 0 -> copy-free lane-dense path, multi-step grid.
    B, C, H, W = 2, 4, 16, 16  # NCHW, C == NUM_CLASS
    x_a, t_a = _make_example(k_a, (B, C, H, W))
    out_a = jax.block_until_ready(smooth_heatmap_loss(x_a, t_a))
    ref_a = _reference(x_a, t_a)
    assert out_a.shape == (B, C, H, W)
    assert out_a.dtype == jnp.float32
    assert jnp.allclose(out_a, ref_a, atol=1e-5, rtol=1e-5), "mismatch (case 1)"

    # Case 1b: force tiny tiles to exercise many grid steps.
    out_a2 = jax.block_until_ready(
        smooth_heatmap_loss(x_a, t_a, target_tile_rows=8))
    assert jnp.allclose(out_a2, ref_a, atol=1e-5, rtol=1e-5), "mismatch (case 1b)"

    # Case 2: total NOT divisible by 128 -> copy-free (rows, W) fallback path
    # with a partial last row-block.
    x_b, t_b = _make_example(k_b, (2, 4, 15, 15))
    out_b = jax.block_until_ready(smooth_heatmap_loss(x_b, t_b))
    ref_b = _reference(x_b, t_b)
    assert out_b.shape == (2, 4, 15, 15)
    assert jnp.allclose(out_b, ref_b, atol=1e-5, rtol=1e-5), "mismatch (case 2)"

    # Case 3: bf16 I/O path (half the HBM bytes on bandwidth-bound v5e/v6e).
    x_c, t_c = _make_example(k_c, (B, C, H, W))
    x_c = x_c.astype(jnp.bfloat16)
    t_c = t_c.astype(jnp.bfloat16)
    out_c = jax.block_until_ready(smooth_heatmap_loss(x_c, t_c))
    ref_c = _reference(x_c.astype(jnp.float32), t_c.astype(jnp.float32))
    assert out_c.dtype == jnp.bfloat16
    assert jnp.allclose(out_c.astype(jnp.float32), ref_c, atol=2e-2, rtol=2e-2), \
        "mismatch (case 3)"

    print("KERNEL_OK")
</pallas_src>

<mosaic_0001>
module attributes {stable_mosaic.version = 11 : i64} {
  func.func @_smooth_heatmap_loss_kernel(%arg0: i32, %arg1: memref<8x128xf32, #tpu.memory_space<vmem>>, %arg2: memref<8x128xf32, #tpu.memory_space<vmem>>, %arg3: memref<8x128xf32, #tpu.memory_space<vmem>>) attributes {dimension_semantics = [#tpu.dimension_semantics<parallel>], iteration_bounds = array<i64: 2>, scalar_prefetch = 0 : i64, scratch_operands = 0 : i64, tpu.core_type = #tpu.core_type<tc>, window_params = [{transform_indices = @transform_0, window_bounds = array<i64: 8, 128>}, {transform_indices = @transform_1, window_bounds = array<i64: 8, 128>}, {transform_indices = @transform_2, window_bounds = array<i64: 8, 128>}]} {
    %c0 = arith.constant 0 : index
    %c0_0 = arith.constant 0 : index
    %0 = vector.load %arg1[%c0, %c0_0] : memref<8x128xf32, #tpu.memory_space<vmem>>, vector<8x128xf32>
    %c0_1 = arith.constant 0 : index
    %c0_2 = arith.constant 0 : index
    %1 = vector.load %arg2[%c0_1, %c0_2] : memref<8x128xf32, #tpu.memory_space<vmem>>, vector<8x128xf32>
    %2 = arith.negf %0 : vector<8x128xf32>
    %3 = math.exp %2 : vector<8x128xf32>
    %cst = arith.constant 1.000000e+00 : f32
    %4 = vector.broadcast %cst : f32 to vector<8x128xf32>
    %5 = arith.addf %4, %3 : vector<8x128xf32>
    %6 = arith.divf %4, %5 : vector<8x128xf32>
    %cst_3 = arith.constant 1.000000e+00 : f32
    %7 = vector.broadcast %cst_3 : f32 to vector<8x128xf32>
    %8 = arith.subf %7, %6 : vector<8x128xf32>
    %cst_4 = arith.constant 1.000000e+00 : f32
    %9 = vector.broadcast %cst_4 : f32 to vector<8x128xf32>
    %10 = arith.cmpf oeq, %1, %9 : vector<8x128xf32>
    %cst_5 = arith.constant 9.900000e-01 : f32
    %11 = vector.broadcast %cst_5 : f32 to vector<8x128xf32>
    %12 = arith.mulf %1, %11 : vector<8x128xf32>
    %cst_6 = arith.constant 2.500000e-03 : f32
    %13 = vector.broadcast %cst_6 : f32 to vector<8x128xf32>
    %14 = arith.addf %12, %13 : vector<8x128xf32>
    %cst_7 = arith.constant 1.000000e+00 : f32
    %15 = vector.broadcast %cst_7 : f32 to vector<8x128xf32>
    %16 = arith.subf %15, %14 : vector<8x128xf32>
    %17 = arith.mulf %16, %16 : vector<8x128xf32>
    %18 = arith.mulf %17, %17 : vector<8x128xf32>
    %cst_8 = arith.constant 5.000000e+00 : f32
    %19 = vector.broadcast %cst_8 : f32 to vector<8x128xf32>
    %20 = arith.mulf %19, %14 : vector<8x128xf32>
    %21 = arith.mulf %8, %8 : vector<8x128xf32>
    %22 = arith.mulf %20, %21 : vector<8x128xf32>
    %23 = arith.mulf %6, %6 : vector<8x128xf32>
    %24 = arith.mulf %18, %23 : vector<8x128xf32>
    %25 = arith.select %10, %22, %24 : vector<8x128xi1>, vector<8x128xf32>
    %26 = arith.select %10, %6, %8 : vector<8x128xi1>, vector<8x128xf32>
    %cst_9 = arith.constant 9.99999982E-15 : f32
    %27 = vector.broadcast %cst_9 : f32 to vector<8x128xf32>
    %28 = arith.addf %26, %27 : vector<8x128xf32>
    %29 = math.log %28 : vector<8x128xf32>
    %cst_10 = arith.constant 0.000000e+00 : f32
    %30 = vector.broadcast %cst_10 : f32 to vector<8x128xf32>
    %31 = arith.subf %30, %25 : vector<8x128xf32>
    %32 = arith.mulf %31, %29 : vector<8x128xf32>
    %c0_11 = arith.constant 0 : index
    %c0_12 = arith.constant 0 : index
    %33 = vector.load %arg3[%c0_11, %c0_12] : memref<8x128xf32, #tpu.memory_space<vmem>>, vector<8x128xf32>
    tpu.vector_store %arg3[%c0_11, %c0_12], %32 {strides = array<i32>} : memref<8x128xf32, #tpu.memory_space<vmem>>, vector<8x128xf32>,
    return
  }
  func.func @transform_0(%arg0: i32) -> (i32, i32) {
    %c0_i32 = arith.constant 0 : i32
    %c0_i32_0 = arith.constant 0 : i32
    return %arg0, %c0_i32 : i32, i32
  }
  func.func @transform_1(%arg0: i32) -> (i32, i32) {
    %c0_i32 = arith.constant 0 : i32
    %c0_i32_0 = arith.constant 0 : i32
    return %arg0, %c0_i32 : i32, i32
  }
  func.func @transform_2(%arg0: i32) -> (i32, i32) {
    %c0_i32 = arith.constant 0 : i32
    %c0_i32_0 = arith.constant 0 : i32
    return %arg0, %c0_i32 : i32, i32
  }
}

</mosaic_0001>

<bundles_post_ra>
// kernel: tpu_custom_call.1
= control target key start
LH: loop header
LB: loop body
LE: loop exit
PB: predicated region body
PF: predicated region fallthrough
CT: control target
= control target key end

     0   :  { %7 = vsyncpa [#allocation3], 0  ;;  %s768_s0 = inlined_call_operand.hbm [shape: f32[16,128], index: 0, kind: input, shape index: {}]   ;;  %s769_s1 = inlined_call_operand.hbm [shape: f32[16,128], index: 1, kind: input, shape index: {}]   ;;  %s770_s2 = inlined_call_operand.hbm [shape: f32[16,128], index: 2, kind: output, shape index: {}]  }
   0x1   :  { %9 = vsyncpa [#allocation3 + $0x1], 0 }
   0x2   :  { %10 = vsyncpa [#allocation6], 0 }
   0x3   :  { %12 = vsyncpa [#allocation6 + $0x1], 0 }
   0x4   :  { %13 = vsyncpa [#allocation4], 0 }
   0x5   :  { %15 = vsyncpa [#allocation4 + $0x1], 0  ;;  %s554_s9 = smov 0   ;;  %s556_s10 = smov 0  }
   0x6   :  { %s558_s11 = smov 0   ;;  %s560_s12 = smov 0  }
   0x7 LB: > { %s575_s13 = sadd.s32 4294967295, %s534_s12   ;;  %s331_s14 = sadd.s32 4294967294, %s534_s12   ;;  %s534_s12 = sphi %s560_s12, %s789_s12   ;;  %s530_s11 = sphi %s558_s11, %s788_s11   ;;  %s526_s10 = sphi %s556_s10, %s787_s10   ;;  %s522_s9 = sphi %s554_s9, %s786_s9  }
   0x8   : > { %s579_s15 = sadd.s32 1, %s534_s12   ;;  %s28_s16 = sadd.s32 1, %s530_s11 }
   0x9   : > { %s25_s17 = ssub.s32 %s534_s12, %s579_s15  ;;  %p35_p0 = scmp.ne.s32.totalorder %s530_s11, %s526_s10 }
   0xa   : > { %p26_p1 = scmp.eq.s32.totalorder %s25_s17, 0  ;;  %p36_p2 = scmp.eq.s32.totalorder %s534_s12, 0 }
   0xb   : > { %p41_p3 = scmp.ne.s32.totalorder %s526_s10, %s522_s9  ;;  %p42_p4 = scmp.eq.s32.totalorder %s575_s13, 0 }
   0xc   : > { %s591_s18 = scalar_select %p26_p1, %s530_s11, %s28_s16  }
   0xd   : > { %p593_p5 = por %p36_p2, %p35_p0  ;;  %p597_p6 = por %p42_p4, %p41_p3 }
   0xe   : > { %p91_p7 = scmp.eq.s32.totalorder %s575_s13, 1  ;;  %p97_p8 = scmp.eq.s32.totalorder %s331_s14, 1 }
   0xf   : > { %s774_s20 = scalar_select %p597_p6, 1, 0 }
  0x10   : > { %p364_p10 = scmp.lt.s32.totalorder %s534_s12, 2  ;;  %p604_p11 = por %p91_p7, %p35_p0 }
  0x11   : > { %p608_p12 = por %p97_p8, %p41_p3  ;;  %s613_s23 = sand.u32 1, %s530_s11  }
  0x12   : > { %s775_s21 = scalar_select %p604_p11, 1, 0 }
  0x13   : > { %s776_s22 = scalar_select %p608_p12, 1, 0 }
  0x14   : > { %s335_s24 = sshll.u32 %s534_s12, 7  ;;  %s334_s25 = sshll.u32 %s613_s23, 3 }
  0x15   : > { %s622_s28 = scalar_lea.hbm %s768_s0, %s335_s24  ;;  %s121_s29 = scalar_lea.vmem [#allocation2], %s334_s25 }
  0x16   : > { %s128_s30 = sshll.u32 %s121_s29, 4  ;;  %p628_p13 = pnand %p364_p10, %p593_p5  ;;  %s632_s30 = int_to_ptr.vmem [resolvable:$true] %s128_s30 }
  0x17   : > { %s118_s4 = scalar_lea.sflag [#allocation3], %s613_s23  ;;  %s404_s5 = scalar_lea.hbm %s622_s28, 128 }
  0x18   : > { %p405_p2 = scmp.ne.s32.totalorder %s622_s28, %s404_s5  ;;  %p406_p3 = pneg %p628_p13 }
  0x19   : > { %s409_s8 = scalar_lea.hbm %s768_s0, 256  ;;  %p410_p5 = scmp.lt.u32.totalorder %s622_s28, %s768_s0 }
  0x1a   : > { %p407_p4 = pnand %p406_p3, %p405_p2  ;;  %p411_p8 = scmp.lt.u32.totalorder %s409_s8, %s404_s5 }
  0x1b   : > { %p413_p9 = scmp.lt.u32.totalorder %s404_s5, %s622_s28 }
  0x1c   : > { %p408_p7 = pneg %p407_p4  ;;  %p412_p10 = por %p411_p8, %p410_p5 }
  0x1e   : > { %p414_p0 = por %p413_p9, %p412_p10 }
  0x20   : > { %p415_p1 = pnand %p414_p0, %p408_p7 }
  0x22   : > { %418 = shalt.err (!%p415_p1)
}
  0x23   : > { %s419_s17 = scalar_lea.vmem %s632_s30, 128  ;;  %s536_s19 = smov [#allocation2]  }
  0x24   : > { %p420_p2 = scmp.ne.s32.totalorder %s632_s30, %s419_s17  ;;  %s424_s26 = sshll.u32 %s536_s19, 4  ;;  %s425_s26 = int_to_ptr.vmem [resolvable:$false] %s424_s26 }
  0x25   : > { %s426_s27 = scalar_lea.vmem %s425_s26, 256  ;;  %p427_p11 = scmp.lt.s32.totalorder %s632_s30, %s425_s26 }
  0x26   : > { %p422_p4 = pnand %p420_p2, %p406_p3  ;;  %p428_p5 = scmp.lt.s32.totalorder %s426_s27, %s419_s17 }
  0x28   : > { %p423_p12 = pneg %p422_p4  ;;  %p429_p8 = por %p428_p5, %p427_p11 }
  0x2a   : > { %p430_p9 = pnand %p429_p8, %p423_p12 }
  0x2c   : > { %433 = shalt.err (!%p430_p9)
}
  0x2d   : > { %356 = dma.hbm_to_vmem [thread:$0]  (!%p628_p13), %s622_s28, 128, %s632_s30, %s118_s4  }
  0x2e   : > { %p778_p0 = scmp.lt.s32.totalorder %s534_s12, 3  ;;  %p779_p1 = scmp.ge.s32.totalorder %s534_s12, 1 }
  0x2f   : > { %s675_s7 = scalar_lea.hbm %s769_s1, %s335_s24  ;;  %s139_s8 = scalar_lea.vmem [#allocation5], %s334_s25 }
  0x30   : > { %p666_p7 = pnand %p779_p1, %p778_p0  ;;  %s146_s14 = sshll.u32 %s139_s8, 4  ;;  %s147_s14 = int_to_ptr.vmem [resolvable:$true] %s146_s14 }
  0x31   : > { %s136_s28 = scalar_lea.sflag [#allocation6], %s613_s23  ;;  %s434_s30 = scalar_lea.hbm %s675_s7, 128 }
  0x32   : > { %s780_s29 = scalar_select %p666_p7, 1, 0 }
  0x33   : > { %p435_p11 = scmp.ne.s32.totalorder %s675_s7, %s434_s30  ;;  %s439_s24 = scalar_lea.hbm %s769_s1, 256 }
  0x34   : > { %p440_p2 = scmp.lt.u32.totalorder %s675_s7, %s769_s1  ;;  %p441_p4 = scmp.lt.u32.totalorder %s439_s24, %s434_s30 }
  0x35   : > { %p437_p12 = pnand %p435_p11, %p406_p3  ;;  %p443_p8 = scmp.lt.u32.totalorder %s434_s30, %s675_s7 }
  0x36   : > { %p442_p5 = por %p441_p4, %p440_p2 }
  0x37   : > { %p438_p10 = pneg %p437_p12 }
  0x38   : > { %p444_p9 = por %p443_p8, %p442_p5 }
  0x3a   : > { %p445_p0 = pnand %p444_p9, %p438_p10 }
  0x3c   : > { %448 = shalt.err (!%p445_p0)
}
  0x3d   : > { %s449_s23 = scalar_lea.vmem %s147_s14, 128  ;;  %s537_s25 = smov [#allocation5]  }
  0x3e   : > { %p450_p1 = scmp.ne.s32.totalorder %s147_s14, %s449_s23  ;;  %s454_s26 = sshll.u32 %s537_s25, 4  ;;  %s455_s26 = int_to_ptr.vmem [resolvable:$false] %s454_s26 }
  0x3f   : > { %s456_s27 = scalar_lea.vmem %s455_s26, 256  ;;  %p457_p6 = scmp.lt.s32.totalorder %s147_s14, %s455_s26 }
  0x40   : > { %p452_p11 = pnand %p450_p1, %p406_p3  ;;  %p458_p7 = scmp.lt.s32.totalorder %s456_s27, %s449_s23 }
  0x42   : > { %p453_p12 = pneg %p452_p11  ;;  %p459_p2 = por %p458_p7, %p457_p6 }
  0x44   : > { %p460_p4 = pnand %p459_p2, %p453_p12 }
  0x46   : > { %463 = shalt.err (!%p460_p4)
}
  0x47   : > { %359 = dma.hbm_to_vmem [thread:$0]  (!%p628_p13), %s675_s7, 128, %s147_s14, %s136_s28  }
  0x48   : > { %p781_p10 = scmp.ne.s32.totalorder %s780_s29, 0 }
  0x49   : > { %s702_s5 = sand.u32 (!%p781_p10), 1, %s526_s10   ;;  %p782_p6 = scmp.ne.s32.totalorder (!%p781_p10), %s774_s20, 0 }
  0x4a   : > { %155 = sbr.rel (%p781_p10) target bundleno = 145 (0x91), region = 28  ;;  %s705_s6 = sshll.u32 (!%p781_p10), %s702_s5, 3 }
  0x4b   : > { %s158_s8 = scalar_lea.sflag (!%p781_p10), [#allocation3], %s702_s5  ;;  %s161_s30 = scalar_lea.vmem (!%p781_p10), [#allocation2], %s705_s6 }
  0x51   : > { %509 = dma.done.wait (%p782_p6), %s158_s8, 128  }
  0x52   : > { %511 = vsyncadd (%p782_p6), %s158_s8, 4294967168  ;;  %s167_s3 = scalar_lea.sflag [#allocation6], %s702_s5  ;;  %s170_s29 = scalar_lea.vmem [#allocation5], %s705_s6 }
  0x53   : > { %513 = dma.done.wait (%p782_p6), %s167_s3, 128  }
  0x54   : > { %515 = vsyncadd (%p782_p6), %s167_s3, 4294967168  ;;  %v196_v0 = vld [vmem:[%s161_s30] sm:$0xff]  ;;  %v197_v3 = vld [vmem:[%s170_s29] sm:$0xff]  ;;  %s195_s20 = scalar_lea.vmem [#allocation7], %s705_s6  ;;  %s344_s14 = sshll.u32 %s575_s13, 7 }
  0x55   : > { %v342_v1 = vmul.f32 -1.442695, %v196_v0  ;;  %v206_v5 = vmul.f32 0.99, %v197_v3  ;;  %vm205_vm0 = vcmp.eq.f32.partialorder %v197_v3, 1.0  ;;  %s238_s7 = sshll.u32 %s195_s20, 4  ;;  %s726_s16 = scalar_lea.hbm %s770_s2, %s344_s14  ;;  %s721_s7 = int_to_ptr.vmem [resolvable:$true] %s238_s7 }
  0x56   : > { %s225_s24 = scalar_lea.sflag [#allocation4], %s702_s5  ;;  %s464_s17 = scalar_lea.vmem %s721_s7, 128 }
  0x57   : > { %398 = vpow2.f32 %v342_v1  ;;  %v207_v6 = vadd.f32 0.0025, %v206_v5  ;;  %p465_p13 = scmp.ne.s32.totalorder %s721_s7, %s464_s17  ;;  %p783_p3 = scmp.ne.s32.totalorder %s775_s21, 0 }
  0x58   : > { %s538_s13 = smov [#allocation7]  }
  0x59   : > { %v208_v7 = vsub.f32 1.0, %v207_v6  ;;  %v211_v11 = vmul.f32 5.0, %v207_v6  ;;  %p466_p7 = pnand %p465_p13, %p783_p3  ;;  %s468_s19 = sshll.u32 %s538_s13, 4  ;;  %s469_s19 = int_to_ptr.vmem [resolvable:$false] %s468_s19 }
  0x5a   : > { %s470_s23 = scalar_lea.vmem %s469_s19, 256  ;;  %p471_p8 = scmp.lt.s32.totalorder %s721_s7, %s469_s19 }
  0x5b   : > { %v209_v9 = vmul.f32 %v208_v7, %v208_v7  ;;  %p467_p5 = pneg %p466_p7  ;;  %p472_p9 = scmp.lt.s32.totalorder %s470_s23, %s464_s17 }
  0x5d   : > { %v210_v13 = vmul.f32 %v209_v9, %v209_v9  ;;  %p473_p0 = por %p472_p9, %p471_p8 }
  0x5f   : > { %p474_p1 = pnand %p473_p0, %p467_p5 }
  0x61   : > { %v399_v2 = vpop.eup %398 }
  0x62   : > { %v201_v4 = vadd.f32 1.0, %v399_v2 }
  0x64   : > { %400 = vrcp.f32 %v201_v4 }
  0x6e   : > { %v401_v8 = vpop.eup %400 }
  0x6f   : > { %v204_v10 = vsub.f32 1.0, %v401_v8  ;;  %v214_v15 = vmul.f32 %v401_v8, %v401_v8 }
  0x71   : > { %v217_v12 = vsel %vm205_vm0, %v401_v8, %v204_v10  ;;  %v212_v14 = vmul.f32 %v204_v10, %v204_v10  ;;  %v215_v18 = vmul.f32 %v214_v15, %v210_v13 }
  0x72   : > { %v218_v16 = vadd.f32 1e-14, %v217_v12 }
  0x73   : > { %v213_v17 = vmul.f32 %v212_v14, %v211_v11 }
  0x74   : > { %402 = vlog2.f32 %v218_v16 }
  0x75   : > { %v216_v19 = vsel %vm205_vm0, %v213_v17, %v215_v18 }
  0x76   : > { %v221_v20 = vsub.f32 0.0, %v216_v19 }
  0x7e   : > { %v403_v21 = vpop.eup %402 }
  0x7f   : > { %v220_v22 = vmul.f32 0.6931472, %v403_v21 }
  0x81   : > { %v222_v23 = vmul.f32 %v221_v20, %v220_v22 }
  0x83   : > { %223 = vst [vmem:[%s195_s20] sm:$0xff] %v222_v23 }
  0x84   : > { %477 = shalt.err (!%p474_p1)
}
  0x85   : > { %s478_s25 = scalar_lea.hbm %s726_s16, 128  ;;  %s482_s5 = scalar_lea.hbm %s770_s2, 256 }
  0x86   : > { %p479_p11 = scmp.ne.s32.totalorder %s726_s16, %s478_s25  ;;  %p483_p4 = scmp.lt.u32.totalorder %s726_s16, %s770_s2 }
  0x87   : > { %p484_p10 = scmp.lt.u32.totalorder %s482_s5, %s478_s25  ;;  %p486_p13 = scmp.lt.u32.totalorder %s478_s25, %s726_s16 }
  0x88   : > { %p480_p12 = pnand %p479_p11, %p783_p3 }
  0x89   : > { %p485_p6 = por %p484_p10, %p483_p4 }
  0x8a   : > { %p481_p2 = pneg %p480_p12 }
  0x8b   : > { %p487_p7 = por %p486_p13, %p485_p6 }
  0x8d   : > { %p488_p5 = pnand %p487_p7, %p481_p2 }
  0x8f   : > { %491 = shalt.err (!%p488_p5)
}
  0x90   : > { %351 = dma.vmem_to_hbm [thread:$0]  (%p783_p3), %s721_s7, 128, %s726_s16, %s225_s24  }
  0x91 PF: > { %s250_s30 = sand.u32 1, %s522_s9   ;;  %p784_p8 = scmp.ne.s32.totalorder %s776_s22, 0 }
  0x92   : > { %p785_p9 = scmp.ge.s32.totalorder %s534_s12, 2  ;;  %s251_s3 = scalar_lea.sflag [#allocation4], %s250_s30 }
  0x94   : > { %p361_p0 = pnand %p785_p9, %p784_p8 }
  0x96   : > { %517 = dma.done.wait (!%p361_p0), %s251_s3, 128  }
  0x97   : > { %519 = vsyncadd (!%p361_p0), %s251_s3, 4294967168  ;;  %p18_p1 = scmp.ge.s32.totalorder %s579_s15, 4   ;;  %s786_s9 = smov %s526_s10 }
  0x98   : > { %s787_s10 = smov %s530_s11  ;;  %s788_s11 = smov %s591_s18 }
  0x99   : > { %s789_s12 = smov %s579_s15  ;;  %20 = sbr.rel (!%p18_p1) target bundleno = 7 (0x7), region = 86 }
  0xa0   :  { %256 = vsyncpa [#allocation3], 1 }
  0xa1   :  { %258 = vsyncpa [#allocation3 + $0x1], 1 }
  0xa2   :  { %259 = vsyncpa [#allocation6], 1 }
  0xa3   :  { %261 = vsyncpa [#allocation6 + $0x1], 1 }
  0xa4   :  { %262 = vsyncpa [#allocation4], 1 }
  0xa5   :  { %264 = vsyncpa [#allocation4 + $0x1], 1 }

</bundles_post_ra>
